<compile_context>
chip_gen: v6e
topology: v6e:2x2x1
jax: 0.10.0
libtpu: 0.0.40
codegen_flags: <defaults>
</compile_context>

<pallas_src>
import math

import jax
import jax.numpy as jnp
from jax.experimental import pallas as pl
from jax.experimental.pallas import tpu as pltpu


def _coord_grid(H, W):
    """torch-style linspace grids, flattened lane-dense: (2, HW), row0=x, row1=y."""
    y = jnp.linspace(-H / 2.0, H / 2.0, H, dtype=jnp.float32)
    x = jnp.linspace(-W / 2.0, W / 2.0, W, dtype=jnp.float32)
    yg, xg = jnp.meshgrid(y, x, indexing="ij")                       # (H, W)
    return jnp.stack([xg.reshape(-1), yg.reshape(-1)], axis=0)       # (2, HW)


# ---------------------------------------------------------------------------
# Fused kernel: 1x1 conv (C -> 1) as a VPU channel reduction + sigmoid +
# mass-centroid reduction, all on the VMEM-resident tile.
# Layout: x (B, C, HW) lane-dense over HW; grid over batch tiles ("parallel").
# ---------------------------------------------------------------------------
def _fused_fwd_centroid_kernel(x_ref, w_ref, b_ref, g_ref, p_ref, c_ref):
    w = w_ref[...].astype(jnp.float32)            # (C, 1)
    b = b_ref[...].astype(jnp.float32)            # (1, 1)
    g = g_ref[...]                                # (2, HW) f32: row0=x, row1=y coords
    bt = x_ref.shape[0]                           # static batch-tile size (unrolled)
    for i in range(bt):
        xb = x_ref[i].astype(jnp.float32)                       # (C, HW)
        # C->1 channel reduction on VPU+XLU (no M=1 MXU matmul).
        logits = jnp.sum(xb * w, axis=0, keepdims=True) + b     # (1, HW)
        p = jax.nn.sigmoid(logits)                              # (1, HW) f32 (EUP)
        p_ref[i] = p.astype(p_ref.dtype)
        # Centroid: lane reductions; single combined (2,1) numerator, one store.
        mass = jnp.sum(p, axis=1, keepdims=True) + 1e-8         # (1, 1)
        nums = jnp.sum(p * g, axis=1, keepdims=True)            # (2, 1) = [x_num, y_num]
        c_ref[i] = (nums / mass).astype(c_ref.dtype)            # exact divide (tolerance)


def localizer_forward_and_centroid(x_nchw, weight, bias):
    B, C, H, W = x_nchw.shape
    HW = H * W
    x = x_nchw.reshape(B, C, HW)             # no dtype upcast in the wrapper
    w = weight.reshape(C, 1)
    b = bias.reshape(1, 1)
    g = _coord_grid(H, W)                    # (2, HW) f32

    # Batch tile (unrolled in-kernel). Keep >=2 parallel grid blocks when B
    # allows so the v7x dual TensorCore both get work.
    bt = 8 if (B >= 16 and B % 8 == 0) else 1
    grid = (B // bt,)

    itemsize = jnp.dtype(x.dtype).itemsize
    cost = pl.CostEstimate(
        flops=int(B * HW * (2 * C + 6)),
        transcendentals=int(B * HW),
        bytes_accessed=int(x.size * itemsize + B * HW * itemsize
                           + B * 2 * 4 + (C + 1 + 2 * HW) * 4),
    )

    probmap, centroids = pl.pallas_call(
        _fused_fwd_centroid_kernel,
        out_shape=(
            jax.ShapeDtypeStruct((B, 1, HW), x.dtype),        # probability map
            jax.ShapeDtypeStruct((B, 2, 1), jnp.float32),     # [x_c; y_c] per sample
        ),
        grid_spec=pltpu.PrefetchScalarGridSpec(
            num_scalar_prefetch=0,
            grid=grid,
            in_specs=[
                pl.BlockSpec((bt, C, HW), lambda i: (i, 0, 0)),
                pl.BlockSpec((C, 1), lambda i: (0, 0)),
                pl.BlockSpec((1, 1), lambda i: (0, 0)),
                pl.BlockSpec((2, HW), lambda i: (0, 0)),
            ],
            out_specs=[
                pl.BlockSpec((bt, 1, HW), lambda i: (i, 0, 0)),
                pl.BlockSpec((bt, 2, 1), lambda i: (i, 0, 0)),
            ],
        ),
        compiler_params=pltpu.CompilerParams(dimension_semantics=("parallel",)),
        cost_estimate=cost,
    )(x, w, b, g)

    return probmap.reshape(B, 1, H, W), centroids.reshape(B, 1, 2)


def localizer_forward(x_nchw, weight, bias):
    """LocalizerClassifier.forward(x) == model(x): the (B,1,H,W) probability map."""
    return localizer_forward_and_centroid(x_nchw, weight, bias)[0]


# ---------------------------------------------------------------------------
# Standalone mass_centroid (dependent function used in get_loss), tiled over
# N*C rows with a lane-dense (rows, HW) layout and precomputed coord rows.
# ---------------------------------------------------------------------------
def _mass_centroid_kernel(t_ref, g_ref, o_ref):
    t = t_ref[...].astype(jnp.float32)           # (nt, HW)
    g = g_ref[...]                               # (2, HW)
    mass = jnp.sum(t, axis=1, keepdims=True) + 1e-8                 # (nt, 1)
    x_num = jnp.sum(t * g[0:1], axis=1, keepdims=True)              # (nt, 1)
    y_num = jnp.sum(t * g[1:2], axis=1, keepdims=True)              # (nt, 1)
    o_ref[...] = (jnp.concatenate([x_num, y_num], axis=1) / mass).astype(o_ref.dtype)


def mass_centroid(t_nchw):
    N, C, H, W = t_nchw.shape
    NC, HW = N * C, H * W
    t = t_nchw.reshape(NC, HW)                   # lane-dense, no dtype upcast
    g = _coord_grid(H, W)
    # Row tile: a multiple of 8 dividing NC (<=256) so blocks double-buffer and
    # stay far under the v7x 32 MiB scoped-VMEM budget; whole thing if NC tiny.
    nt = math.gcd(NC, 256) if (NC % 8 == 0 and NC > 8) else NC
    grid = (NC // nt,)

    itemsize = jnp.dtype(t.dtype).itemsize
    cost = pl.CostEstimate(
        flops=int(NC * HW * 5),
        transcendentals=0,
        bytes_accessed=int(t.size * itemsize + NC * 2 * 4 + 2 * HW * 4),
    )

    out = pl.pallas_call(
        _mass_centroid_kernel,
        out_shape=jax.ShapeDtypeStruct((NC, 2), jnp.float32),
        grid_spec=pltpu.PrefetchScalarGridSpec(
            num_scalar_prefetch=0,
            grid=grid,
            in_specs=[
                pl.BlockSpec((nt, HW), lambda i: (i, 0)),
                pl.BlockSpec((2, HW), lambda i: (0, 0)),
            ],
            out_specs=pl.BlockSpec((nt, 2), lambda i: (i, 0)),
        ),
        compiler_params=pltpu.CompilerParams(dimension_semantics=("parallel",)),
        cost_estimate=cost,
    )(t, g)
    return out.reshape(N, C, 2)


if __name__ == "__main__":
    key = jax.random.PRNGKey(0)
    k1, k2, k3 = jax.random.split(key, 3)

    B, C, H, W = 2, 4, 16, 16
    x = jax.random.normal(k1, (B, C, H, W), jnp.float32)
    # Synthetic Conv2d(C, 1, kernel_size=1) parameters (deterministic).
    weight = jax.random.normal(k2, (1, C, 1, 1), jnp.float32) * 0.5
    bias = jax.random.normal(k3, (1,), jnp.float32) * 0.1

    # Fused forward (the module's forward output) + centroid (get_loss path).
    probmap, centroids = localizer_forward_and_centroid(x, weight, bias)
    probmap = jax.block_until_ready(probmap)
    centroids = jax.block_until_ready(centroids)

    # Standalone mass_centroid kernel on the forward output.
    cent_standalone = jax.block_until_ready(mass_centroid(probmap))

    # ---- pure-JAX references ----
    ref_prob = jax.nn.sigmoid(
        jnp.einsum("bchw,c->bhw", x, weight.reshape(C)) + bias[0]
    )[:, None, :, :]
    assert probmap.shape == (B, 1, H, W)
    assert jnp.allclose(probmap, ref_prob, atol=1e-5), "forward mismatch"

    y_coords = jnp.linspace(-H / 2, H / 2, H)
    x_coords = jnp.linspace(-W / 2, W / 2, W)
    y_grid, x_grid = jnp.meshgrid(y_coords, x_coords, indexing="ij")
    mass = ref_prob.sum(axis=(-2, -1)) + 1e-8
    x_c = (ref_prob * x_grid).sum(axis=(-2, -1)) / mass
    y_c = (ref_prob * y_grid).sum(axis=(-2, -1)) / mass
    ref_cent = jnp.stack([x_c, y_c], axis=-1)
    assert centroids.shape == (B, 1, 2)
    assert jnp.allclose(centroids, ref_cent, atol=1e-4), "fused centroid mismatch"
    assert cent_standalone.shape == (B, 1, 2)
    assert jnp.allclose(cent_standalone, ref_cent, atol=1e-4), "mass_centroid mismatch"

    print("KERNEL_OK")
</pallas_src>

<mosaic_0001>
module attributes {stable_mosaic.version = 11 : i64} {
  func.func @_fused_fwd_centroid_kernel(%arg0: i32, %arg1: memref<1x4x256xf32, #tpu.memory_space<vmem>>, %arg2: memref<4x1xf32, #tpu.memory_space<vmem>>, %arg3: memref<1x1xf32, #tpu.memory_space<vmem>>, %arg4: memref<2x256xf32, #tpu.memory_space<vmem>>, %arg5: memref<1x1x256xf32, #tpu.memory_space<vmem>>, %arg6: memref<1x2x1xf32, #tpu.memory_space<vmem>>) attributes {dimension_semantics = [#tpu.dimension_semantics<parallel>], iteration_bounds = array<i64: 2>, scalar_prefetch = 0 : i64, scratch_operands = 0 : i64, tpu.core_type = #tpu.core_type<tc>, window_params = [{transform_indices = @transform_0, window_bounds = array<i64: 1, 4, 256>}, {pipeline_mode = #tpu.pipeline_mode<synchronous>, transform_indices = @transform_1, window_bounds = array<i64: 4, 1>}, {pipeline_mode = #tpu.pipeline_mode<synchronous>, transform_indices = @transform_2, window_bounds = array<i64: 1, 1>}, {pipeline_mode = #tpu.pipeline_mode<synchronous>, transform_indices = @transform_3, window_bounds = array<i64: 2, 256>}, {transform_indices = @transform_4, window_bounds = array<i64: 1, 1, 256>}, {transform_indices = @transform_5, window_bounds = array<i64: 1, 2, 1>}]} {
    %c0 = arith.constant 0 : index
    %c0_0 = arith.constant 0 : index
    %0 = vector.load %arg2[%c0, %c0_0] : memref<4x1xf32, #tpu.memory_space<vmem>>, vector<4x1xf32>
    %c0_1 = arith.constant 0 : index
    %c0_2 = arith.constant 0 : index
    %1 = vector.load %arg3[%c0_1, %c0_2] : memref<1x1xf32, #tpu.memory_space<vmem>>, vector<1x1xf32>
    %c0_3 = arith.constant 0 : index
    %c0_4 = arith.constant 0 : index
    %2 = vector.load %arg4[%c0_3, %c0_4] : memref<2x256xf32, #tpu.memory_space<vmem>>, vector<2x256xf32>
    %c0_5 = arith.constant 0 : index
    %c0_6 = arith.constant 0 : index
    %c0_7 = arith.constant 0 : index
    %3 = vector.load %arg1[%c0_5, %c0_6, %c0_7] : memref<1x4x256xf32, #tpu.memory_space<vmem>>, vector<1x4x256xf32>
    %4 = vector.shape_cast %3 : vector<1x4x256xf32> to vector<4x256xf32>
    %5 = vector.broadcast %0 : vector<4x1xf32> to vector<4x256xf32>
    %6 = arith.mulf %4, %5 : vector<4x256xf32>
    %cst = arith.constant dense<0.000000e+00> : vector<256xf32>
    %7 = vector.multi_reduction <add>, %6, %cst [0] : vector<4x256xf32> to vector<256xf32>
    %8 = vector.shape_cast %7 : vector<256xf32> to vector<1x256xf32>
    %9 = vector.broadcast %1 : vector<1x1xf32> to vector<1x256xf32>
    %10 = arith.addf %8, %9 : vector<1x256xf32>
    %11 = arith.negf %10 : vector<1x256xf32>
    %12 = math.exp %11 : vector<1x256xf32>
    %cst_8 = arith.constant 1.000000e+00 : f32
    %13 = vector.broadcast %cst_8 : f32 to vector<1x256xf32>
    %14 = arith.addf %13, %12 : vector<1x256xf32>
    %15 = arith.divf %13, %14 : vector<1x256xf32>
    %c0_9 = arith.constant 0 : index
    %c0_10 = arith.constant 0 : index
    %c0_11 = arith.constant 0 : index
    %16 = vector.load %arg5[%c0_9, %c0_10, %c0_11] : memref<1x1x256xf32, #tpu.memory_space<vmem>>, vector<1x1x256xf32>
    %17 = vector.shape_cast %16 : vector<1x1x256xf32> to vector<1x256xf32>
    %18 = vector.shape_cast %15 : vector<1x256xf32> to vector<1x1x256xf32>
    tpu.vector_store %arg5[%c0_9, %c0_10, %c0_11], %18 {strides = array<i32>} : memref<1x1x256xf32, #tpu.memory_space<vmem>>, vector<1x1x256xf32>,
    %cst_12 = arith.constant dense<0.000000e+00> : vector<1xf32>
    %19 = vector.multi_reduction <add>, %15, %cst_12 [1] : vector<1x256xf32> to vector<1xf32>
    %20 = vector.shape_cast %19 : vector<1xf32> to vector<1x1xf32>
    %cst_13 = arith.constant 9.99999993E-9 : f32
    %21 = vector.broadcast %cst_13 : f32 to vector<1x1xf32>
    %22 = arith.addf %20, %21 : vector<1x1xf32>
    %23 = vector.broadcast %15 : vector<1x256xf32> to vector<2x256xf32>
    %24 = arith.mulf %23, %2 : vector<2x256xf32>
    %cst_14 = arith.constant dense<0.000000e+00> : vector<2xf32>
    %25 = vector.multi_reduction <add>, %24, %cst_14 [1] : vector<2x256xf32> to vector<2xf32>
    %26 = vector.shape_cast %25 : vector<2xf32> to vector<2x1xf32>
    %27 = vector.broadcast %22 : vector<1x1xf32> to vector<2x1xf32>
    %28 = arith.divf %26, %27 : vector<2x1xf32>
    %c0_15 = arith.constant 0 : index
    %c0_16 = arith.constant 0 : index
    %c0_17 = arith.constant 0 : index
    %29 = vector.load %arg6[%c0_15, %c0_16, %c0_17] : memref<1x2x1xf32, #tpu.memory_space<vmem>>, vector<1x2x1xf32>
    %30 = vector.shape_cast %29 : vector<1x2x1xf32> to vector<2x1xf32>
    %31 = vector.shape_cast %28 : vector<2x1xf32> to vector<1x2x1xf32>
    tpu.vector_store %arg6[%c0_15, %c0_16, %c0_17], %31 {strides = array<i32>} : memref<1x2x1xf32, #tpu.memory_space<vmem>>, vector<1x2x1xf32>,
    return
  }
  func.func @transform_0(%arg0: i32) -> (i32, i32, i32) {
    %c0_i32 = arith.constant 0 : i32
    %c0_i32_0 = arith.constant 0 : i32
    %c0_i32_1 = arith.constant 0 : i32
    return %arg0, %c0_i32, %c0_i32_0 : i32, i32, i32
  }
  func.func @transform_1(%arg0: i32) -> (i32, i32) {
    %c0_i32 = arith.constant 0 : i32
    %c0_i32_0 = arith.constant 0 : i32
    %c0_i32_1 = arith.constant 0 : i32
    return %c0_i32, %c0_i32_0 : i32, i32
  }
  func.func @transform_2(%arg0: i32) -> (i32, i32) {
    %c0_i32 = arith.constant 0 : i32
    %c0_i32_0 = arith.constant 0 : i32
    %c0_i32_1 = arith.constant 0 : i32
    return %c0_i32, %c0_i32_0 : i32, i32
  }
  func.func @transform_3(%arg0: i32) -> (i32, i32) {
    %c0_i32 = arith.constant 0 : i32
    %c0_i32_0 = arith.constant 0 : i32
    %c0_i32_1 = arith.constant 0 : i32
    return %c0_i32, %c0_i32_0 : i32, i32
  }
  func.func @transform_4(%arg0: i32) -> (i32, i32, i32) {
    %c0_i32 = arith.constant 0 : i32
    %c0_i32_0 = arith.constant 0 : i32
    %c0_i32_1 = arith.constant 0 : i32
    return %arg0, %c0_i32, %c0_i32_0 : i32, i32, i32
  }
  func.func @transform_5(%arg0: i32) -> (i32, i32, i32) {
    %c0_i32 = arith.constant 0 : i32
    %c0_i32_0 = arith.constant 0 : i32
    %c0_i32_1 = arith.constant 0 : i32
    return %arg0, %c0_i32, %c0_i32_0 : i32, i32, i32
  }
}

</mosaic_0001>

<bundles_post_ra>
// kernel: tpu_custom_call.1
= control target key start
LH: loop header
LB: loop body
LE: loop exit
PB: predicated region body
PF: predicated region fallthrough
CT: control target
= control target key end

     0   :  { %s843_s0 = inlined_call_operand.hbm [shape: f32[2,4,256], index: 0, kind: input, shape index: {}]   ;;  %s844_s1 = inlined_call_operand.vmem [shape: f32[4,1], index: 1, kind: input, shape index: {}]   ;;  %s845_s2 = inlined_call_operand.<no memory space> [shape: f32[1,1], index: 2, kind: input, shape index: {}]   ;;  %s846_s3 = inlined_call_operand.vmem [shape: f32[2,256], index: 3, kind: input, shape index: {}]   ;;  %s847_s4 = inlined_call_operand.hbm [shape: f32[2,1,256], index: 4, kind: output, shape index: {0}]   ;;  %s848_s5 = inlined_call_operand.vmem [shape: f32[2,2,1], index: 5, kind: output, shape index: {1}]  }
   0x1   :  { %v11_v0 = vstv %s845_s2 }
   0x2   :  { %12 = vst [vmem:[#allocation2] sm:$0x1] %v11_v0 }
   0x3   :  { %13 = vsyncpa [#allocation4], 0 }
   0x4   :  { %15 = vsyncpa [#allocation4 + $0x1], 0 }
   0x5   :  { %16 = vsyncpa [#allocation5], 0 }
   0x6   :  { %18 = vsyncpa [#allocation5 + $0x1], 0  ;;  %s690_s20 = smov 0   ;;  %s692_s21 = smov 0  }
   0x7   :  { %s694_s22 = smov 0   ;;  %s696_s23 = smov 0  }
   0x8 LB: > { %s711_s2 = sadd.s32 4294967295, %s650_s23   ;;  %s478_s24 = sadd.s32 4294967294, %s650_s23   ;;  %s650_s23 = sphi %s696_s23, %s865_s23   ;;  %s646_s22 = sphi %s694_s22, %s864_s22   ;;  %s642_s21 = sphi %s692_s21, %s863_s21   ;;  %s638_s20 = sphi %s690_s20, %s862_s20  }
   0x9   : > { %s715_s25 = sadd.s32 1, %s650_s23   ;;  %s31_s26 = sadd.s32 1, %s646_s22 }
   0xa   : > { %s28_s27 = ssub.s32 %s650_s23, %s715_s25  ;;  %p38_p0 = scmp.ne.s32.totalorder %s646_s22, %s642_s21 }
   0xb   : > { %p29_p1 = scmp.eq.s32.totalorder %s28_s27, 0  ;;  %p39_p2 = scmp.eq.s32.totalorder %s650_s23, 0 }
   0xc   : > { %p44_p3 = scmp.ne.s32.totalorder %s642_s21, %s638_s20  ;;  %p45_p4 = scmp.eq.s32.totalorder %s711_s2, 0 }
   0xd   : > { %s727_s28 = scalar_select %p29_p1, %s646_s22, %s31_s26  }
   0xe   : > { %p729_p5 = por %p39_p2, %p38_p0  ;;  %p733_p6 = por %p45_p4, %p44_p3 }
   0xf   : > { %p131_p7 = scmp.eq.s32.totalorder %s711_s2, 1  ;;  %p137_p8 = scmp.eq.s32.totalorder %s478_s24, 1 }
  0x10   : > { %s852_s30 = scalar_select %p733_p6, 1, 0 }
  0x11   : > { %p510_p10 = scmp.lt.s32.totalorder %s650_s23, 2  ;;  %p740_p11 = por %p131_p7, %p38_p0 }
  0x12   : > { %p744_p12 = por %p137_p8, %p44_p3  ;;  %s192_s8 = sand.u32 1, %s646_s22  }
  0x13   : > { %s853_s6 = scalar_select %p740_p11, 1, 0 }
  0x14   : > { %s854_s7 = scalar_select %p744_p12, 1, 0 }
  0x15   : > { %s496_s9 = sshll.u32 %s650_s23, 7  ;;  %s481_s10 = sshll.u32 %s192_s8, 3 }
  0x16   : > { %s753_s13 = scalar_lea.hbm %s843_s0, %s496_s9  ;;  %s196_s14 = scalar_lea.vmem [#allocation3], %s481_s10 }
  0x17   : > { %s204_s15 = sshll.u32 %s196_s14, 4  ;;  %p757_p13 = pnand %p510_p10, %p729_p5  ;;  %s761_s15 = int_to_ptr.vmem [resolvable:$true] %s204_s15 }
  0x18   : > { %s193_s17 = scalar_lea.sflag [#allocation4], %s192_s8  ;;  %s558_s18 = scalar_lea.hbm %s753_s13, 128 }
  0x19   : > { %p559_p2 = scmp.ne.s32.totalorder %s753_s13, %s558_s18  ;;  %p560_p3 = pneg %p757_p13 }
  0x1a   : > { %s563_s26 = scalar_lea.hbm %s843_s0, 256  ;;  %p564_p5 = scmp.lt.s32.totalorder %s753_s13, %s843_s0 }
  0x1b   : > { %p561_p4 = pnand %p560_p3, %p559_p2  ;;  %p565_p8 = scmp.lt.s32.totalorder %s563_s26, %s558_s18 }
  0x1d   : > { %p562_p7 = pneg %p561_p4  ;;  %p566_p10 = por %p565_p8, %p564_p5 }
  0x1f   : > { %p567_p9 = pnand %p566_p10, %p562_p7 }
  0x21   : > { %570 = shalt.err (!%p567_p9)
}
  0x22   : > { %s571_s8 = scalar_lea.vmem %s761_s15, 128  ;;  %s652_s9 = smov [#allocation3]  }
  0x23   : > { %p572_p0 = scmp.ne.s32.totalorder %s761_s15, %s571_s8  ;;  %s576_s10 = sshll.u32 %s652_s9, 4  ;;  %s577_s10 = int_to_ptr.vmem [resolvable:$false] %s576_s10 }
  0x24   : > { %s578_s11 = scalar_lea.vmem %s577_s10, 256  ;;  %p579_p4 = scmp.lt.s32.totalorder %s761_s15, %s577_s10 }
  0x25   : > { %p574_p1 = pnand %p572_p0, %p560_p3  ;;  %p580_p12 = scmp.lt.s32.totalorder %s578_s11, %s571_s8 }
  0x27   : > { %p575_p2 = pneg %p574_p1  ;;  %p581_p11 = por %p580_p12, %p579_p4 }
  0x29   : > { %p582_p6 = pnand %p581_p11, %p575_p2 }
  0x2b   : > { %585 = shalt.err (!%p582_p6)
}
  0x2c   : > { %505 = dma.hbm_to_vmem [thread:$0]  (!%p757_p13), %s753_s13, 128, %s761_s15, %s193_s17  }
  0x2d   : > { %p856_p9 = scmp.lt.s32.totalorder %s650_s23, 3  ;;  %p857_p7 = scmp.ge.s32.totalorder %s650_s23, 1 }
  0x2f   : > { %p210_p0 = pnand %p857_p7, %p856_p9 }
  0x30   : > { %s788_s12 = sand.u32 (!%p210_p0), 1, %s642_s21   ;;  %p858_p6 = scmp.ne.s32.totalorder (!%p210_p0), %s852_s30, 0 }
  0x31   : > { %213 = sbr.rel (%p210_p0) target bundleno = 393 (0x189), region = 36  ;;  %s485_s14 = sshll.u32 (!%p210_p0), %s788_s12, 3 }
  0x32   : > { %s216_s18 = scalar_lea.sflag (!%p210_p0), [#allocation4], %s788_s12  ;;  %s219_s19 = scalar_lea.vmem (!%p210_p0), [#allocation3], %s485_s14 }
  0x36   : > { %629 = dma.done.wait (%p858_p6), %s216_s18, 128  }
  0x37   : > { %631 = vsyncadd (%p858_p6), %s216_s18, 4294967168  ;;  %v653_v1 = vmov 0   ;;  %v254_v2 = vld [vmem:[%s844_s1] sm:$0xf]  ;;  %v654_v4 = vmov 839922192   ;;  %v265_v6 = vlaneseq }
  0x38   : > { %547 = vset.pattern.permute.xlu0 %v653_v1  ;;  %v255_v3 = vld [vmem:[#allocation2] sm:$0x1]  ;;  %v263_v5 = vunpack.c.l.s4 %v654_v4  ;;  %v257_v10 = vld [vmem:[%s219_s19] sm:$0xff]  ;;  %vm274_vm0 = vcmask 1043456   ;;  %v655_v40 = vmov 1966171168  }
  0x39   : > { %260 = vperm.xlu0 %547, %v254_v2   ;;  %v266_v8 = vshrl.u32 %v265_v6, 7  ;;  %v316_v41 = vunpack.c.l.s4 %v655_v40  ;;  %v490_v42 = vld.sshfl [vmem:[%s846_s3] sm:$0x33 pattern:$0x76325410]  ;;  %vm352_vm1 = vcmask 1041408  }
  0x3a   : > { %v264_v7 = vunpack.c.0.s8 %v263_v5  ;;  %v347_v44 = vcombine.high %v490_v42, %v490_v42  ;;  %s486_s17 = sshll.u32 %s788_s12, 1  ;;  %vm332_vm2 = vcmp.lt.s32.totalorder %v265_v6, 256  ;;  %s497_s26 = sshll.u32 %s711_s2, 5 }
  0x3b   : > { %v296_v24 = vsub.s32 0, %v266_v8  ;;  %v317_v43 = vunpack.c.0.s8 %v316_v41  ;;  %s243_s24 = scalar_lea.vmem [#allocation6], %s486_s17  ;;  %s379_s9 = scalar_lea.hbm %s847_s4, %s497_s26 }
  0x3c   : > { %v267_v9 = vsub.s32 %v264_v7, %v266_v8  ;;  %s381_s27 = sshll.u32 %s243_s24, 4  ;;  %s363_s10 = scalar_lea.sflag [#allocation5], %s788_s12  ;;  %s382_s27 = int_to_ptr.vmem [resolvable:$true] %s381_s27 }
  0x3d   : > { %291 = vperm.xlu0 %547, %v255_v3   ;;  %v320_v46 = vsub.s32 %v317_v43, %v266_v8  ;;  %s586_s11 = scalar_lea.vmem %s382_s27, 32  ;;  %p859_p12 = scmp.ne.s32.totalorder %s853_s6, 0 }
  0x3e   : > { %p587_p11 = scmp.ne.s32.totalorder %s382_s27, %s586_s11  ;;  %s656_s14 = smov [#allocation6]  }
  0x3f   : > { %s590_s18 = sshll.u32 %s656_s14, 4  ;;  %s591_s18 = int_to_ptr.vmem [resolvable:$false] %s590_s18 }
  0x40   : > { %p588_p13 = pnand %p587_p11, %p859_p12  ;;  %s592_s19 = scalar_lea.vmem %s591_s18, 64 }
  0x41   : > { %p593_p3 = scmp.lt.s32.totalorder %s382_s27, %s591_s18  ;;  %p594_p5 = scmp.lt.s32.totalorder %s592_s19, %s586_s11 }
  0x42   : > { %p589_p1 = pneg %p588_p13 }
  0x43   : > { %p595_p8 = por %p594_p5, %p593_p3 }
  0x45   : > { %p596_p10 = pnand %p595_p8, %p589_p1 }
  0xb4   : > { %v261_v11 = vpop.permute.xlu0 %260 }
  0xb5   : > { %v268_v12 = vrot.slane %v261_v11, %v267_v9 }
  0xb7   : > { %v270_v13 = vmul.f32 %v268_v12, %v257_v10 }
  0xb8   : > { %v292_v25 = vpop.permute.xlu0 %291 }
  0xb9   : > { %v272_v14 = vcombine.high %v270_v13, %v270_v13  ;;  %v275_v15 = vsel %vm274_vm0, %v270_v13, 0.0  ;;  %v297_v30 = vrot.slane %v292_v25, %v296_v24 }
  0xba   : > { %v276_v16 = vrot.slane %v275_v15, 4 }
  0xbb   : > { %v282_v17 = vsel %vm274_vm0, %v272_v14, 0.0 }
  0xbc   : > { %v277_v18 = vadd.f32 %v276_v16, %v275_v15  ;;  %v283_v19 = vrot.slane %v282_v17, 4 }
  0xbe   : > { %v278_v20 = vrot.slane %v277_v18, 2  ;;  %v284_v21 = vadd.f32 %v283_v19, %v282_v17 }
  0xc0   : > { %v279_v22 = vadd.f32 %v278_v20, %v277_v18  ;;  %v285_v23 = vrot.slane %v284_v21, 2 }
  0xc2   : > { %v280_v26 = vrot.slane %v279_v22, 1  ;;  %v286_v27 = vadd.f32 %v285_v23, %v284_v21 }
  0xc4   : > { %v281_v28 = vadd.f32 %v280_v26, %v279_v22  ;;  %v287_v29 = vrot.slane %v286_v27, 1 }
  0xc6   : > { %v288_v31 = vadd.f32 %v287_v29, %v286_v27  ;;  %v298_v32 = vadd.f32 %v297_v30, %v281_v28 }
  0xc8   : > { %v299_v33 = vadd.f32 %v297_v30, %v288_v31  ;;  %v488_v34 = vmul.f32 -1.442695, %v298_v32 }
  0xca   : > { %548 = vpow2.f32 %v488_v34  ;;  %v489_v35 = vmul.f32 -1.442695, %v299_v33 }
  0xcc   : > { %550 = vpow2.f32 %v489_v35 }
  0xd7   : > { %v549_v36 = vpop.eup %548 }
  0xd8   : > { %v306_v37 = vadd.f32 1.0, %v549_v36 }
  0xd9   : > { %v551_v38 = vpop.eup %550 }
  0xda   : > { %v307_v39 = vadd.f32 1.0, %v551_v38  ;;  %552 = vrcp.f32 %v306_v37 }
  0xdc   : > { %554 = vrcp.f32 %v307_v39 }
  0xe7   : > { %v553_v45 = vpop.eup %552 }
  0xe8   : > { %v350_v47 = vmul.f32 %v553_v45, %v490_v42 }
  0xe9   : > { %v555_v48 = vpop.eup %554 }
  0xea   : > { %v335_v49 = vadd.f32 %v555_v48, %v553_v45  ;;  %v351_v50 = vmul.f32 %v555_v48, %v347_v44  ;;  %v314_v51 = vcombine.low %v553_v45, %v555_v48  ;;  %v353_v52 = vsel %vm352_vm1, %v350_v47, 0.0 }
  0xec   : > { %336 = vadd.xlane.f32.xlu1 %v335_v49  ;;  %v354_v53 = vsel %vm352_vm1, %v351_v50, 0.0  ;;  %v321_v54 = vrot.slane %v314_v51, %v320_v46 }
  0xed   : > { %v355_v55 = vadd.f32 %v354_v53, %v353_v52 }
  0xee   : > { %v328_v56 = vrot.slane %v321_v54, %v320_v46 }
  0xf0   : > { %356 = vadd.xlane.f32.xlu1 %v355_v55  ;;  %334 = vst.msk [vmem:[%s243_s24] sm:$0x3] %vm332_vm2, %v328_v56 }
  0xf1   : > { %599 = shalt.err (!%p596_p10)
}
  0xf2   : > { %s600_s13 = scalar_lea.hbm %s379_s9, 32  ;;  %s604_s30 = scalar_lea.hbm %s847_s4, 64 }
  0xf3   : > { %p601_p2 = scmp.ne.s32.totalorder %s379_s9, %s600_s13  ;;  %p605_p7 = scmp.lt.s32.totalorder %s379_s9, %s847_s4 }
  0xf4   : > { %p606_p0 = scmp.lt.s32.totalorder %s604_s30, %s600_s13 }
  0xf5   : > { %p602_p4 = pnand %p601_p2, %p859_p12 }
  0xf6   : > { %p607_p6 = por %p606_p0, %p605_p7 }
  0xf7   : > { %p603_p9 = pneg %p602_p4 }
  0xf9   : > { %p608_p11 = pnand %p607_p6, %p603_p9 }
  0xfb   : > { %611 = shalt.err (!%p608_p11)
}
  0xfc   : > { %500 = dma.vmem_to_hbm [thread:$0]  (%p859_p12), %s382_s27, 32, %s379_s9, %s363_s10   ;;  %vm360_vm3 = vcmask 1024  }
  0xfd   : > { %p250_p13 = scmp.lt.s32.totalorder %s711_s2, 1 }
  0xff   : > { %s867_s2 = smov (!%p250_p13, %s711_s2), 1 }
 0x100   : > { %s487_s24 = sshll.u32 %s867_s2, 1 }
 0x101   : > { %s253_s8 = scalar_lea.vmem %s848_s5, %s487_s24 }
 0x175   : > { %v337_v57 = vpop.xlane.xlu1 %336 }
 0x176   : > { %v338_v58 = vadd.f32 1e-08, %v337_v57 }
 0x178   : > { %556 = vrcp.f32 %v338_v58 }
 0x179   : > { %v357_v60 = vpop.xlane.xlu1 %356 }
 0x185   : > { %v557_v59 = vpop.eup %556 }
 0x186   : > { %v359_v61 = vmul.f32 %v557_v59, %v357_v60 }
 0x188   : > { %361 = vst.msk [vmem:[%s253_s8] sm:$0x3] %vm360_vm3, %v359_v61 }
 0x189 PF: > { %s396_s6 = sand.u32 1, %s638_s20   ;;  %p860_p12 = scmp.ne.s32.totalorder %s854_s7, 0 }
 0x18a   : > { %p861_p1 = scmp.ge.s32.totalorder %s650_s23, 2  ;;  %s397_s27 = scalar_lea.sflag [#allocation5], %s396_s6 }
 0x18c   : > { %p507_p3 = pnand %p861_p1, %p860_p12 }
 0x18e   : > { %p508_p5 = pneg %p507_p3 }
 0x190   : > { %633 = dma.done.wait (%p508_p5), %s397_s27, 32  }
 0x191   : > { %635 = vsyncadd (%p508_p5), %s397_s27, 4294967264  ;;  %p21_p8 = scmp.ge.s32.totalorder %s715_s25, 4   ;;  %s862_s20 = smov %s642_s21 }
 0x192   : > { %s863_s21 = smov %s646_s22  ;;  %s864_s22 = smov %s727_s28 }
 0x193   : > { %s865_s23 = smov %s715_s25  ;;  %23 = sbr.rel (!%p21_p8) target bundleno = 8 (0x8), region = 93 }
 0x198   :  { %409 = vsyncpa [#allocation4], 1 }
 0x199   :  { %411 = vsyncpa [#allocation4 + $0x1], 1 }
 0x19a   :  { %412 = vsyncpa [#allocation5], 1 }
 0x19b   :  { %414 = vsyncpa [#allocation5 + $0x1], 1 }

</bundles_post_ra>
